<compile_context>
chip_gen: v7x
topology: tpu7x:2x2x1
jax: 0.10.0
libtpu: 0.0.40
codegen_flags: <defaults>
</compile_context>

<pallas_src>
import functools
from typing import Any

import jax
import jax.numpy as jnp
from jax.experimental import pallas as pl
from jax.experimental.pallas import tpu as pltpu

_LANE = 128


def _round_up(n: int, m: int) -> int:
    return ((n + m - 1) // m) * m


# ----------------------------------------------------------------------------
# Pallas kernel: y = relu(x @ W + b)
#   x: (TM, Hp) bf16   W: (Hp, Op) bf16   b: (1, Op) f32   y: (TM, Op) f32
# Hp, Op are multiples of 128 (lane-dense); matmul accumulates in f32 on MXU,
# bias add / relu run on the VPU in f32.
# ----------------------------------------------------------------------------
def _linear_relu_kernel(x_ref, w_ref, b_ref, o_ref):
    acc = jnp.dot(x_ref[...], w_ref[...], preferred_element_type=jnp.float32)
    o_ref[...] = jnp.maximum(acc + b_ref[...], 0.0).astype(o_ref.dtype)


@functools.partial(jax.jit, static_argnames=("block_batch",))
def linear_relu_pallas(x: jax.Array, w: jax.Array, b: jax.Array,
                       *, block_batch: int = 512) -> jax.Array:
    """relu(x @ w + b) via Pallas.  x:(B,H) f32, w:(H,O) f32, b:(1,O) f32."""
    B, H = x.shape
    Hw, O = w.shape
    assert Hw == H

    Hp = _round_up(H, _LANE)
    Op = _round_up(O, _LANE)

    # Layout plumbing in the wrapper: bf16 operands, lane-dense zero padding.
    x_bf = x.astype(jnp.bfloat16)
    w_p = jnp.pad(w.astype(jnp.bfloat16), ((0, Hp - H), (0, Op - O)))
    b_p = jnp.pad(b.astype(jnp.float32).reshape(1, O), ((0, 0), (0, Op - O)))

    if B <= block_batch:
        # Small batch: single tile, no grid -> no per-step pipeline overhead.
        Bp = _round_up(B, 16)  # bf16 sublane packing
        x_p = jnp.pad(x_bf, ((0, Bp - B), (0, Hp - H)))
        y_p = pl.pallas_call(
            _linear_relu_kernel,
            out_shape=jax.ShapeDtypeStruct((Bp, Op), jnp.float32),
            in_specs=[
                pl.BlockSpec(memory_space=pltpu.MemorySpace.VMEM),
                pl.BlockSpec(memory_space=pltpu.MemorySpace.VMEM),
                pl.BlockSpec(memory_space=pltpu.MemorySpace.VMEM),
            ],
            out_specs=pl.BlockSpec(memory_space=pltpu.MemorySpace.VMEM),
        )(x_p, w_p, b_p)
    else:
        # Large batch: tile only the batch axis; weights/bias stay VMEM-resident
        # (constant block index across the grid).  Batch axis is independent ->
        # "parallel" (v7x megacore sharding).  Tile sized well under the v7x
        # scoped-VMEM default (2 x double-buffered (TM,128) tiles + W is << 32 MiB).
        tm = block_batch
        Bp = _round_up(B, tm)
        x_p = jnp.pad(x_bf, ((0, Bp - B), (0, Hp - H)))
        y_p = pl.pallas_call(
            _linear_relu_kernel,
            out_shape=jax.ShapeDtypeStruct((Bp, Op), jnp.float32),
            grid=(Bp // tm,),
            in_specs=[
                pl.BlockSpec((tm, Hp), lambda i: (i, 0)),
                pl.BlockSpec((Hp, Op), lambda i: (0, 0)),
                pl.BlockSpec((1, Op), lambda i: (0, 0)),
            ],
            out_specs=pl.BlockSpec((tm, Op), lambda i: (i, 0)),
            compiler_params=pltpu.CompilerParams(
                dimension_semantics=("parallel",),
                vmem_limit_bytes=32 * 1024 * 1024,
            ),
        )(x_p, w_p, b_p)

    return y_p[:B, :O]


# ----------------------------------------------------------------------------
# Synthetic "LightningModule" whose forward is the Pallas hot path.
# ----------------------------------------------------------------------------
class TinyLightningModule:
    def __init__(self, hidden: int = 32, out: int = 32):
        key = jax.random.PRNGKey(0)
        kw, kb = jax.random.split(key)
        self.weight = (jax.random.normal(kw, (hidden, out), jnp.float32)
                       / jnp.sqrt(jnp.float32(hidden)))
        self.bias = jax.random.normal(kb, (1, out), jnp.float32) * 0.1
        self.trainer = None                    # no trainer attached -> plain forward
        self.automatic_optimization = True
        self._ddp_params_and_buffers_to_ignore = []

    def forward(self, x: jax.Array) -> jax.Array:
        return linear_relu_pallas(x, self.weight, self.bias)

    __call__ = forward

    # *_step methods delegate to forward (what a user LightningModule would do).
    def training_step(self, x, *a, **k):   return self.forward(x)
    def validation_step(self, x, *a, **k): return self.forward(x)
    def test_step(self, x, *a, **k):       return self.forward(x)
    def predict_step(self, x, *a, **k):    return self.forward(x)


# ----------------------------------------------------------------------------
# Wrapper classes mirroring the PyTorch reference (pure Python dispatch glue).
# ----------------------------------------------------------------------------
class _LightningPrecisionModuleWrapperBase:
    def __init__(self, pl_module: Any) -> None:
        self.module = pl_module
        self._ddp_params_and_buffers_to_ignore = getattr(
            pl_module, "_ddp_params_and_buffers_to_ignore", [])

    # Abstract in the reference class: raise NotImplementedError (no compute).
    def training_step(self, *args: Any, **kwargs: Any) -> Any:
        raise NotImplementedError

    def validation_step(self, *args: Any, **kwargs: Any) -> Any:
        raise NotImplementedError

    def test_step(self, *args: Any, **kwargs: Any) -> Any:
        raise NotImplementedError

    def predict_step(self, *args: Any, **kwargs: Any) -> Any:
        raise NotImplementedError

    def forward(self, *args: Any, **kwargs: Any) -> Any:
        raise NotImplementedError

    def on_post_move_to_device(self) -> None:
        pass


def unwrap_lightning_module(wrapped_model: Any) -> Any:
    # TODO(synk): DistributedDataParallel / DataParallel unwrapping has no JAX
    # equivalent here; only Lightning wrapper unwrapping is implemented.
    model = wrapped_model
    if isinstance(model, (_LightningModuleWrapperBase,
                          _LightningPrecisionModuleWrapperBase)):
        model = unwrap_lightning_module(model.module)
    return model


class _LightningModuleWrapperBase:
    def __init__(self, pl_module: Any) -> None:
        self.module = pl_module
        self._ddp_params_and_buffers_to_ignore = getattr(
            pl_module, "_ddp_params_and_buffers_to_ignore", [])

    def forward(self, *inputs: Any, **kwargs: Any) -> Any:
        lightning_module = unwrap_lightning_module(self.module)
        trainer = getattr(lightning_module, "trainer", None)
        if trainer and trainer.training:
            output = self.module.training_step(*inputs, **kwargs)
            if not lightning_module.automatic_optimization:
                # TODO(synk): trainer.model.require_backward_grad_sync has no
                # JAX/Pallas equivalent (DDP grad-sync toggle).
                pass
        elif trainer and trainer.testing:
            output = self.module.test_step(*inputs, **kwargs)
        elif trainer and (trainer.sanity_checking or trainer.validating):
            output = self.module.validation_step(*inputs, **kwargs)
        elif trainer and trainer.predicting:
            output = self.module.predict_step(*inputs, **kwargs)
        else:
            output = self.module(*inputs, **kwargs)
        return output

    __call__ = forward

    def on_post_move_to_device(self) -> None:
        pass


if __name__ == "__main__":
    hidden, out = 32, 32
    key = jax.random.PRNGKey(0)

    inner = TinyLightningModule(hidden=hidden, out=out)
    wrapper = _LightningModuleWrapperBase(inner)

    def ref_bf16(x, w, b):
        # Same math as the kernel: bf16 operands, f32 accumulate.
        y = jnp.dot(x.astype(jnp.bfloat16), w.astype(jnp.bfloat16),
                    preferred_element_type=jnp.float32) + b
        return jnp.maximum(y, 0.0)

    # --- small batch: single-tile, no-grid path (through the wrapper) ---
    batch = 8
    x_small = jax.random.normal(jax.random.fold_in(key, 1), (batch, hidden),
                                jnp.float32)
    y_small = wrapper(x_small)
    jax.block_until_ready(y_small)
    assert y_small.shape == (batch, out)
    assert jnp.allclose(y_small, ref_bf16(x_small, inner.weight, inner.bias),
                        atol=1e-4, rtol=1e-4)
    # loose semantic check against pure-f32 math (bf16 operand rounding only)
    assert jnp.allclose(y_small,
                        jnp.maximum(x_small @ inner.weight + inner.bias, 0.0),
                        atol=5e-2, rtol=5e-2)

    # --- larger batch: exercises the batch-tiled grid path (grid of 2) ---
    big_batch = 200
    x_big = jax.random.normal(jax.random.fold_in(key, 2), (big_batch, hidden),
                              jnp.float32)
    y_big = linear_relu_pallas(x_big, inner.weight, inner.bias, block_batch=128)
    jax.block_until_ready(y_big)
    assert y_big.shape == (big_batch, out)
    assert jnp.allclose(y_big, ref_bf16(x_big, inner.weight, inner.bias),
                        atol=1e-4, rtol=1e-4)

    print("KERNEL_OK")
</pallas_src>

<mosaic_0001>
module attributes {stable_mosaic.version = 11 : i64} {
  func.func @_linear_relu_kernel(%arg0: memref<16x128xbf16, #tpu.memory_space<vmem>>, %arg1: memref<128x128xbf16, #tpu.memory_space<vmem>>, %arg2: memref<1x128xf32, #tpu.memory_space<vmem>>, %arg3: memref<16x128xf32, #tpu.memory_space<vmem>>) attributes {dimension_semantics = [], scalar_prefetch = 0 : i64, scratch_operands = 0 : i64, tpu.core_type = #tpu.core_type<tc>} {
    %c0 = arith.constant 0 : index
    %c0_0 = arith.constant 0 : index
    %0 = vector.load %arg0[%c0, %c0_0] : memref<16x128xbf16, #tpu.memory_space<vmem>>, vector<16x128xbf16>
    %c0_1 = arith.constant 0 : index
    %c0_2 = arith.constant 0 : index
    %1 = vector.load %arg1[%c0_1, %c0_2] : memref<128x128xbf16, #tpu.memory_space<vmem>>, vector<128x128xbf16>
    %cst = arith.constant dense<0.000000e+00> : vector<16x128xf32>
    %2 = tpu.matmul %0, %1, %cst {dimension_numbers = #tpu.dot_dimension_numbers<[1], [0], [0], [1], [0, 0, 1, 1], [], []>} : vector<16x128xbf16>, vector<128x128xbf16>, vector<16x128xf32> -> vector<16x128xf32>
    %c0_3 = arith.constant 0 : index
    %c0_4 = arith.constant 0 : index
    %3 = vector.load %arg2[%c0_3, %c0_4] : memref<1x128xf32, #tpu.memory_space<vmem>>, vector<1x128xf32>
    %4 = vector.broadcast %3 : vector<1x128xf32> to vector<16x128xf32>
    %5 = arith.addf %2, %4 : vector<16x128xf32>
    %cst_5 = arith.constant 0.000000e+00 : f32
    %6 = vector.broadcast %cst_5 : f32 to vector<16x128xf32>
    %7 = arith.maximumf %5, %6 : vector<16x128xf32>
    %c0_6 = arith.constant 0 : index
    %c0_7 = arith.constant 0 : index
    %8 = vector.load %arg3[%c0_6, %c0_7] : memref<16x128xf32, #tpu.memory_space<vmem>>, vector<16x128xf32>
    tpu.vector_store %arg3[%c0_6, %c0_7], %7 {strides = array<i32>} : memref<16x128xf32, #tpu.memory_space<vmem>>, vector<16x128xf32>,
    return
  }
}

</mosaic_0001>

<bundles_post_ra>
// kernel: linear_relu_pallas.1
= control target key start
LH: loop header
LB: loop body
LE: loop exit
PB: predicated region body
PF: predicated region fallthrough
CT: control target
= control target key end

     0   :  { %v193_v0 = vmov 0.0   ;;  %vm194_vm0 = vmmov 0   ;;  %s251_s1 = inlined_call_operand.vmem [shape: bf16[128,128], index: 1, kind: input, shape index: {}]   ;;  %s252_s0 = inlined_call_operand.vmem [shape: bf16[16,128], index: 0, kind: input, shape index: {}]   ;;  %s253_s2 = inlined_call_operand.vmem [shape: f32[1,128], index: 2, kind: input, shape index: {}]   ;;  %s254_s3 = inlined_call_operand.vmem [shape: f32[16,128], index: 3, kind: output, shape index: {}]  }
   0x1   :  { %162 = vmatprep.subr.bf16.mxu0 %v193_v0  ;;  %v184_v1 = vld [vmem:[%s251_s1] sm:$0xff]   ;;  %178 = vmatprep.mubr.msk.bf16.mxu0 %vm194_vm0, %v193_v0  ;;  %v185_v2 = vld [vmem:[%s251_s1 + $0x8] sm:$0xff]   ;;  %v186_v3 = vld [vmem:[%s251_s1 + $0x10] sm:$0xff]  }
   0x2   :  { %163 = vmatpush3.bf16.msra.mxu0 %v184_v1  ;;  %v187_v4 = vld [vmem:[%s251_s1 + $0x18] sm:$0xff]   ;;  %v188_v5 = vld [vmem:[%s251_s1 + $0x20] sm:$0xff]   ;;  %v189_v6 = vld [vmem:[%s251_s1 + $0x28] sm:$0xff]  }
   0x3   :  { %164 = vmatprep.subr.bf16.mxu0 %v193_v0  ;;  %v190_v7 = vld [vmem:[%s251_s1 + $0x30] sm:$0xff]   ;;  %v191_v8 = vld [vmem:[%s251_s1 + $0x38] sm:$0xff]   ;;  %v192_v9 = vld [vmem:[%s252_s0] sm:$0xff]  }
   0x4   :  { %v143_v10 = vld [vmem:[%s253_s2] ss:$0 sm:$0xff] }
   0x6   :  { %165 = vmatpush3.bf16.msra.mxu0 %v185_v2 }
   0x7   :  { %166 = vmatprep.subr.bf16.mxu0 %v193_v0 }
   0xa   :  { %167 = vmatpush3.bf16.msra.mxu0 %v186_v3 }
   0xb   :  { %168 = vmatprep.subr.bf16.mxu0 %v193_v0 }
   0xe   :  { %169 = vmatpush3.bf16.msra.mxu0 %v187_v4 }
   0xf   :  { %170 = vmatprep.subr.bf16.mxu0 %v193_v0 }
  0x12   :  { %171 = vmatpush3.bf16.msra.mxu0 %v188_v5 }
  0x13   :  { %172 = vmatprep.subr.bf16.mxu0 %v193_v0 }
  0x16   :  { %173 = vmatpush3.bf16.msra.mxu0 %v189_v6 }
  0x17   :  { %174 = vmatprep.subr.bf16.mxu0 %v193_v0 }
  0x1a   :  { %175 = vmatpush3.bf16.msra.mxu0 %v190_v7 }
  0x1b   :  { %176 = vmatprep.subr.bf16.mxu0 %v193_v0 }
  0x1e   :  { %177 = vmatpush3.bf16.msra.mxu0 %v191_v8 }
  0x21   :  { %179 = vmatmul.mubr.bf16.vlgmr.msra.gmra.mrb[0].mxu0 %v192_v9 }
  0xf4   :  { %v128_v11 = vpop.f32.mrb[0].mxu0 }
  0xf5   :  { %v129_v12 = vadd.f32 %v143_v10, %v128_v11  ;;  %v180_v13 = vpop.f32.mrb[1].mxu0 }
  0xf6   :  { %v131_v14 = vpop.f32.mrb[2].mxu0 }
  0xf7   :  { %v135_v15 = vmax.f32 %v129_v12, 0.0  ;;  %v132_v16 = vadd.f32 %v143_v10, %v131_v14  ;;  %v181_v17 = vpop.f32.mrb[3].mxu0 }
  0xf9   :  { %137 = vst [vmem:[%s254_s3] sm:$0xff] %v135_v15  ;;  %v136_v18 = vmax.f32 %v132_v16, 0.0 }
  0xfb   :  { %138 = vst [vmem:[%s254_s3 + $0x8] sm:$0xff] %v136_v18 }

</bundles_post_ra>
